<compile_context>
chip_gen: v6e
topology: v6e:2x2x1
jax: 0.10.0
libtpu: 0.0.40
codegen_flags: <defaults>
</compile_context>

<pallas_src>
import math

import jax
import jax.numpy as jnp
from jax import lax
from jax.experimental import pallas as pl
from jax.experimental.pallas import tpu as pltpu


def _round_up(v, m):
    return (v + m - 1) // m * m


def _vmem_budget_bytes():
    """Generation-aware per-core VMEM budget for the pipelined blocks (conservative)."""
    try:
        phys = pltpu.get_tpu_info().vmem_capacity_bytes   # 128 MiB v5e/v6e, 64 MiB v7x
    except Exception:
        phys = 64 << 20                                   # conservative (v7x) fallback
    # Stay well under the default scoped-VMEM limit; leave headroom for the
    # double-buffered pipeline and compiler temporaries (u_all, Lcat/Ucat, spills).
    return min(phys // 4, 16 << 20)


def _is_multi_tensorcore():
    """True on chips with 2 TensorCores (v7x): keep >= 2 grid steps so both get work."""
    try:
        return "v7" in jax.devices()[0].device_kind.lower()
    except Exception:
        return False


def _choose_batch_block(B, per_batch_bytes, fixed_bytes, *, need_two_steps, max_bt=16):
    """Largest divisor of B (<= max_bt) whose pipelined block fits the VMEM budget.

    max_bt is modest because the per-batch loop in the kernel is statically unrolled
    (vreg / code-size pressure), and Bt*N rows saturate the MXU row dim well before 16.
    """
    budget = max(_vmem_budget_bytes() - fixed_bytes, per_batch_bytes)
    best = 1
    for d in range(1, B + 1):
        if B % d:
            continue
        if d > max_bt or d * per_batch_bytes > budget:
            continue
        if need_two_steps and B >= 2 and (B // d) < 2:
            continue
        best = max(best, d)
    return best


def make_t_cheby_conv_ds(c_in, c_out, K, Kt, N, T, B, mxu_dtype=jnp.float32):
    """mxu_dtype=jnp.bfloat16 enables bf16 MXU operands (recommended on v6e/v7x);
    accumulation, Chebyshev recurrence and bias stay f32."""
    assert K >= 2, "module semantics require K >= 2 (L0=I and L1=adj are always emitted)"
    PAD = 1                       # Conv2d(..., padding=(0, 1))
    Tp = T + 2 * PAD              # padded time length
    T_out = Tp - Kt + 1           # conv output width
    CW = c_out * T_out            # logical fused lane width of the output slab
    CWp = _round_up(CW, 128)      # padded -> single unmasked lane-dense store
    XW = c_in * Tp                # fused lane width of the input slab

    f32 = jnp.float32
    xbytes = jnp.dtype(mxu_dtype).itemsize

    # VMEM accounting: double-buffered pipelined blocks + per-batch f32 u_all scratch.
    per_batch_bytes = 2 * (N * N * 4 + N * XW * xbytes + N * CWp * 4) + N * K * CWp * 4
    fixed_bytes = 2 * (XW * K * CWp * xbytes + CWp * 4)   # M + bias (double-buffered)
    Bt = _choose_batch_block(B, per_batch_bytes, fixed_bytes,
                             need_two_steps=_is_multi_tensorcore())
    n_steps = B // Bt

    def kernel(adj_ref, x_ref, m_ref, b_ref, o_ref):
        # ---- Stage 1: ONE fused MXU matmul for the whole batch block and all K orders.
        #      u_all[ib*N + n, k*CWp + co*T_out + t] = sum_{ci,s} x_lay * M
        x2 = x_ref[...].reshape(Bt * N, XW)                         # lane dim untouched
        u_all = jnp.dot(x2, m_ref[...], preferred_element_type=f32)  # [Bt*N, K*CWp] f32

        # Hoisted loop invariants (JAX does not CSE broadcast_in_dim).
        bias_blk = jnp.broadcast_to(b_ref[...], (N, CWp))            # [N, CWp] f32
        if K >= 3:
            rr = lax.broadcasted_iota(jnp.int32, (N, N), 0)
            cc = lax.broadcasted_iota(jnp.int32, (N, N), 1)
            eye = jnp.where(rr == cc, 1.0, 0.0).astype(f32)          # recurrence seed only

        for ib in range(Bt):                                         # statically unrolled, Bt <= 16
            adj = adj_ref[ib]                                        # [N, N] f32
            u_ib = u_all[ib * N:(ib + 1) * N]                        # [N, K*CWp] static slice

            acc = u_ib[:, 0:CWp] + bias_blk                          # k = 0: L0 = I, dot skipped

            # ---- Stage 2: Chebyshev mixing fused over k = 1..K-1 into ONE matmul,
            #      contraction depth (K-1)*N instead of K-1 separate N-deep dots.
            Ls = [adj]                                               # L1 = adj
            if K >= 3:
                adj2 = adj + adj                                     # 2*adj, once per batch (f32)
                Lm2, Lm1 = eye, adj
                for _ in range(2, K):
                    Lk = jnp.dot(adj2, Lm1, preferred_element_type=f32) - Lm2
                    Ls.append(Lk)
                    Lm2, Lm1 = Lm1, Lk
            Lcat = jnp.concatenate(Ls, axis=1)                       # [N, (K-1)*N] f32
            Ucat = jnp.concatenate(
                [u_ib[:, k * CWp:(k + 1) * CWp] for k in range(1, K)], axis=0)  # [(K-1)*N, CWp]
            if mxu_dtype != f32:
                Lcat = Lcat.astype(mxu_dtype)
                Ucat = Ucat.astype(mxu_dtype)
            acc = acc + jnp.dot(Lcat, Ucat, preferred_element_type=f32)

            o_ref[ib] = acc.astype(o_ref.dtype)                      # unmasked lane-dense store

    grid_spec = pltpu.PrefetchScalarGridSpec(
        num_scalar_prefetch=0,
        grid=(n_steps,),
        in_specs=[
            pl.BlockSpec((Bt, N, N), lambda b: (b, 0, 0)),           # adj  (per batch block, f32)
            pl.BlockSpec((Bt, N, XW), lambda b: (b, 0, 0)),          # x_lay (per batch block)
            pl.BlockSpec((XW, K * CWp), lambda b: (0, 0)),           # M    (constant block index)
            pl.BlockSpec((1, CWp), lambda b: (0, 0)),                # bias (constant block index)
        ],
        out_specs=pl.BlockSpec((Bt, N, CWp), lambda b: (b, 0, 0)),
    )

    call = pl.pallas_call(
        kernel,
        out_shape=jax.ShapeDtypeStruct((B, N, CWp), f32),
        grid_spec=grid_spec,
        compiler_params=pltpu.CompilerParams(dimension_semantics=("parallel",)),
    )

    def forward(x, adj, weight, bias):
        # x: [B, c_in, N, T], adj: [B, N, N]
        # weight: [c_out, K*c_in, 1, Kt] (torch Conv2d OIHW, channel index = ci*K + k), bias: [c_out]
        x = x.astype(f32)
        adj = adj.astype(f32)
        weight = weight.astype(f32)
        bias = bias.astype(f32)

        # Lane-dense, time-padded input slab: X_lay[b, n, ci*Tp + s] = x_pad[b, ci, n, s].
        x_lay = jnp.transpose(x, (0, 2, 1, 3))                          # [B, N, c_in, T]
        x_lay = jnp.pad(x_lay, ((0, 0), (0, 0), (0, 0), (PAD, PAD)))    # [B, N, c_in, Tp]
        x_lay = x_lay.reshape(B, N, XW)

        # Banded conv-weight matrix with k on the lane axis:
        #   M[ci*Tp + s, k*CWp + co*T_out + t] = W[co, ci*K+k, 0, s-t]  if 0 <= s-t < Kt else 0
        w4 = weight[:, :, 0, :].reshape(c_out, c_in, K, Kt)             # [c_out, c_in, K, Kt]
        s_idx = jnp.arange(Tp)
        t_idx = jnp.arange(T_out)
        ktap = s_idx[:, None] - t_idx[None, :]                          # [Tp, T_out]
        valid = (ktap >= 0) & (ktap < Kt)
        sel = w4[..., jnp.clip(ktap, 0, Kt - 1)]                        # [c_out, c_in, K, Tp, T_out]
        sel = jnp.where(valid[None, None, None], sel, 0.0)
        M3 = jnp.transpose(sel, (1, 3, 2, 0, 4)).reshape(XW, K, CW)     # (ci,s) x k x (co,t)
        M3 = jnp.pad(M3, ((0, 0), (0, 0), (0, CWp - CW)))               # lane-pad each k slab
        M2 = M3.reshape(XW, K * CWp)

        bias_wide = jnp.pad(jnp.repeat(bias, T_out), (0, CWp - CW))[None, :]   # [1, CWp] f32

        if mxu_dtype != f32:
            # Cast the two large MXU operands in the wrapper: halves HBM->VMEM DMA and
            # avoids per-step VPU casts in the kernel. adj/bias stay f32 (recurrence/adds).
            x_lay = x_lay.astype(mxu_dtype)
            M2 = M2.astype(mxu_dtype)

        out_lay = call(adj, x_lay, M2, bias_wide)                       # [B, N, CWp]
        out_lay = out_lay[:, :, :CW]                                    # drop lane padding
        # TODO(synk): downstream consumers that accept [B, N, c_out*T_out] could skip this
        # transpose (and take a bf16 out_shape) to save an HBM relayout pass.
        return out_lay.reshape(B, N, c_out, T_out).transpose(0, 2, 1, 3)  # [B, c_out, N, T_out]

    return forward


def reference_forward(x, adj, weight, bias, K, Kt):
    """Pure-JAX replica of the PyTorch forward (for verification)."""
    B, c_in, N, T = x.shape
    hp = lax.Precision.HIGHEST
    L0 = jnp.broadcast_to(jnp.eye(N, dtype=x.dtype), (B, N, N))
    L1 = adj
    Ls = [L0, L1]
    for _ in range(2, K):
        L2 = 2.0 * jnp.matmul(adj, L1, precision=hp) - L0
        L0, L1 = L1, L2
        Ls.append(L2)
    Lap = jnp.stack(Ls, axis=1)                 # [B, K, N, N]
    Lap = jnp.swapaxes(Lap, -1, -2)
    xg = jnp.einsum('bcnl,bknq->bckql', x, Lap, precision=hp)   # [B, c_in, K, N, T]
    xg = xg.reshape(B, c_in * K, N, T)
    out = lax.conv_general_dilated(
        xg, weight, window_strides=(1, 1), padding=((0, 0), (1, 1)),
        dimension_numbers=('NCHW', 'OIHW', 'NCHW'), precision=hp)
    return out + bias[None, :, None, None]


if __name__ == "__main__":
    B, c_in, c_out, K, Kt, N, T = 2, 4, 8, 3, 3, 16, 16

    key = jax.random.PRNGKey(0)
    kx, ka, kw, kb = jax.random.split(key, 4)
    x = jax.random.normal(kx, (B, c_in, N, T), dtype=jnp.float32)
    adj = jax.random.normal(ka, (B, N, N), dtype=jnp.float32) / math.sqrt(N)

    # Deterministic Conv2d-style init; shapes from the module __init__.
    fan_in = (K * c_in) * 1 * Kt
    bound = 1.0 / math.sqrt(fan_in)
    weight = jax.random.uniform(kw, (c_out, K * c_in, 1, Kt), dtype=jnp.float32,
                                minval=-bound, maxval=bound)
    bias = jax.random.uniform(kb, (c_out,), dtype=jnp.float32,
                              minval=-bound, maxval=bound)

    # mxu_dtype=jnp.bfloat16 is the recommended setting on v6e/v7x for peak MXU throughput;
    # kept at f32 here so the numerical check against the f32 reference is tight.
    fwd = jax.jit(make_t_cheby_conv_ds(c_in, c_out, K, Kt, N, T, B))
    out = jax.block_until_ready(fwd(x, adj, weight, bias))

    ref = reference_forward(x, adj, weight, bias, K, Kt)
    assert out.shape == ref.shape == (B, c_out, N, T + 3 - Kt), (out.shape, ref.shape)
    if not jnp.allclose(out, ref, rtol=1e-2, atol=1e-2):
        max_err = float(jnp.max(jnp.abs(out - ref)))
        raise AssertionError(f"Pallas kernel mismatch vs reference, max abs err = {max_err}")
    print("KERNEL_OK")
</pallas_src>

<mosaic_0001>
module attributes {stable_mosaic.version = 11 : i64} {
  func.func @kernel(%arg0: i32, %arg1: memref<2x16x16xf32, #tpu.memory_space<vmem>>, %arg2: memref<2x16x72xf32, #tpu.memory_space<vmem>>, %arg3: memref<72x384xf32, #tpu.memory_space<vmem>>, %arg4: memref<1x128xf32, #tpu.memory_space<vmem>>, %arg5: memref<2x16x128xf32, #tpu.memory_space<vmem>>) attributes {dimension_semantics = [#tpu.dimension_semantics<parallel>], iteration_bounds = array<i64: 1>, scalar_prefetch = 0 : i64, scratch_operands = 0 : i64, tpu.core_type = #tpu.core_type<tc>, window_params = [{transform_indices = @transform_0, window_bounds = array<i64: 2, 16, 16>}, {transform_indices = @transform_1, window_bounds = array<i64: 2, 16, 72>}, {pipeline_mode = #tpu.pipeline_mode<synchronous>, transform_indices = @transform_2, window_bounds = array<i64: 72, 384>}, {pipeline_mode = #tpu.pipeline_mode<synchronous>, transform_indices = @transform_3, window_bounds = array<i64: 1, 128>}, {transform_indices = @transform_4, window_bounds = array<i64: 2, 16, 128>}]} {
    %c0 = arith.constant 0 : index
    %c0_0 = arith.constant 0 : index
    %c0_1 = arith.constant 0 : index
    %0 = vector.load %arg2[%c0, %c0_0, %c0_1] : memref<2x16x72xf32, #tpu.memory_space<vmem>>, vector<2x16x72xf32>
    %1 = vector.shape_cast %0 : vector<2x16x72xf32> to vector<32x72xf32>
    %c0_2 = arith.constant 0 : index
    %c0_3 = arith.constant 0 : index
    %2 = vector.load %arg3[%c0_2, %c0_3] : memref<72x384xf32, #tpu.memory_space<vmem>>, vector<72x384xf32>
    %cst = arith.constant dense<0.000000e+00> : vector<32x384xf32>
    %3 = tpu.matmul %1, %2, %cst {dimension_numbers = #tpu.dot_dimension_numbers<[1], [0], [0], [1], [0, 0, 1, 1], [], []>} : vector<32x72xf32>, vector<72x384xf32>, vector<32x384xf32> -> vector<32x384xf32>
    %c0_4 = arith.constant 0 : index
    %c0_5 = arith.constant 0 : index
    %4 = vector.load %arg4[%c0_4, %c0_5] : memref<1x128xf32, #tpu.memory_space<vmem>>, vector<1x128xf32>
    %5 = vector.shape_cast %4 : vector<1x128xf32> to vector<1x128xf32>
    %6 = vector.broadcast %5 : vector<1x128xf32> to vector<16x128xf32>
    %7 = tpu.iota {dimensions = array<i32: 0>} : vector<16x16xi32>
    %8 = tpu.iota {dimensions = array<i32: 1>} : vector<16x16xi32>
    %9 = arith.cmpi eq, %7, %8 : vector<16x16xi32>
    %cst_6 = arith.constant 1.000000e+00 : f32
    %cst_7 = arith.constant 0.000000e+00 : f32
    %10 = vector.broadcast %cst_6 : f32 to vector<16x16xf32>
    %11 = vector.broadcast %cst_7 : f32 to vector<16x16xf32>
    %12 = arith.select %9, %10, %11 : vector<16x16xi1>, vector<16x16xf32>
    %c0_8 = arith.constant 0 : index
    %c0_9 = arith.constant 0 : index
    %c0_10 = arith.constant 0 : index
    %13 = vector.load %arg1[%c0_8, %c0_9, %c0_10] : memref<2x16x16xf32, #tpu.memory_space<vmem>>, vector<1x16x16xf32>
    %14 = vector.shape_cast %13 : vector<1x16x16xf32> to vector<16x16xf32>
    %15 = vector.extract_strided_slice %3 {offsets = [0, 0], sizes = [16, 384], strides = [1, 1]} : vector<32x384xf32> to vector<16x384xf32>
    %16 = vector.extract_strided_slice %15 {offsets = [0, 0], sizes = [16, 128], strides = [1, 1]} : vector<16x384xf32> to vector<16x128xf32>
    %17 = arith.addf %16, %6 : vector<16x128xf32>
    %18 = arith.addf %14, %14 : vector<16x16xf32>
    %cst_11 = arith.constant dense<0.000000e+00> : vector<16x16xf32>
    %19 = tpu.matmul %18, %14, %cst_11 {dimension_numbers = #tpu.dot_dimension_numbers<[1], [0], [0], [1], [0, 0, 1, 1], [], []>} : vector<16x16xf32>, vector<16x16xf32>, vector<16x16xf32> -> vector<16x16xf32>
    %20 = arith.subf %19, %12 : vector<16x16xf32>
    %21 = tpu.concatenate %14, %20 in 1 : vector<16x16xf32>, vector<16x16xf32> -> vector<16x32xf32>
    %22 = vector.extract_strided_slice %15 {offsets = [0, 128], sizes = [16, 128], strides = [1, 1]} : vector<16x384xf32> to vector<16x128xf32>
    %23 = vector.extract_strided_slice %15 {offsets = [0, 256], sizes = [16, 128], strides = [1, 1]} : vector<16x384xf32> to vector<16x128xf32>
    %24 = tpu.concatenate %22, %23 in 0 : vector<16x128xf32>, vector<16x128xf32> -> vector<32x128xf32>
    %cst_12 = arith.constant dense<0.000000e+00> : vector<16x128xf32>
    %25 = tpu.matmul %21, %24, %cst_12 {dimension_numbers = #tpu.dot_dimension_numbers<[1], [0], [0], [1], [0, 0, 1, 1], [], []>} : vector<16x32xf32>, vector<32x128xf32>, vector<16x128xf32> -> vector<16x128xf32>
    %26 = arith.addf %17, %25 : vector<16x128xf32>
    %c0_13 = arith.constant 0 : index
    %c0_14 = arith.constant 0 : index
    %c0_15 = arith.constant 0 : index
    %27 = vector.load %arg5[%c0_13, %c0_14, %c0_15] : memref<2x16x128xf32, #tpu.memory_space<vmem>>, vector<1x16x128xf32>
    %28 = vector.shape_cast %27 : vector<1x16x128xf32> to vector<16x128xf32>
    %29 = vector.shape_cast %26 : vector<16x128xf32> to vector<1x16x128xf32>
    tpu.vector_store %arg5[%c0_13, %c0_14, %c0_15], %29 {strides = array<i32>} : memref<2x16x128xf32, #tpu.memory_space<vmem>>, vector<1x16x128xf32>,
    %c1 = arith.constant 1 : index
    %c0_16 = arith.constant 0 : index
    %c0_17 = arith.constant 0 : index
    %30 = vector.load %arg1[%c1, %c0_16, %c0_17] : memref<2x16x16xf32, #tpu.memory_space<vmem>>, vector<1x16x16xf32>
    %31 = vector.shape_cast %30 : vector<1x16x16xf32> to vector<16x16xf32>
    %32 = vector.extract_strided_slice %3 {offsets = [16, 0], sizes = [16, 384], strides = [1, 1]} : vector<32x384xf32> to vector<16x384xf32>
    %33 = vector.extract_strided_slice %32 {offsets = [0, 0], sizes = [16, 128], strides = [1, 1]} : vector<16x384xf32> to vector<16x128xf32>
    %34 = arith.addf %33, %6 : vector<16x128xf32>
    %35 = arith.addf %31, %31 : vector<16x16xf32>
    %cst_18 = arith.constant dense<0.000000e+00> : vector<16x16xf32>
    %36 = tpu.matmul %35, %31, %cst_18 {dimension_numbers = #tpu.dot_dimension_numbers<[1], [0], [0], [1], [0, 0, 1, 1], [], []>} : vector<16x16xf32>, vector<16x16xf32>, vector<16x16xf32> -> vector<16x16xf32>
    %37 = arith.subf %36, %12 : vector<16x16xf32>
    %38 = tpu.concatenate %31, %37 in 1 : vector<16x16xf32>, vector<16x16xf32> -> vector<16x32xf32>
    %39 = vector.extract_strided_slice %32 {offsets = [0, 128], sizes = [16, 128], strides = [1, 1]} : vector<16x384xf32> to vector<16x128xf32>
    %40 = vector.extract_strided_slice %32 {offsets = [0, 256], sizes = [16, 128], strides = [1, 1]} : vector<16x384xf32> to vector<16x128xf32>
    %41 = tpu.concatenate %39, %40 in 0 : vector<16x128xf32>, vector<16x128xf32> -> vector<32x128xf32>
    %cst_19 = arith.constant dense<0.000000e+00> : vector<16x128xf32>
    %42 = tpu.matmul %38, %41, %cst_19 {dimension_numbers = #tpu.dot_dimension_numbers<[1], [0], [0], [1], [0, 0, 1, 1], [], []>} : vector<16x32xf32>, vector<32x128xf32>, vector<16x128xf32> -> vector<16x128xf32>
    %43 = arith.addf %34, %42 : vector<16x128xf32>
    %c1_20 = arith.constant 1 : index
    %c0_21 = arith.constant 0 : index
    %c0_22 = arith.constant 0 : index
    %44 = vector.load %arg5[%c1_20, %c0_21, %c0_22] : memref<2x16x128xf32, #tpu.memory_space<vmem>>, vector<1x16x128xf32>
    %45 = vector.shape_cast %44 : vector<1x16x128xf32> to vector<16x128xf32>
    %46 = vector.shape_cast %43 : vector<16x128xf32> to vector<1x16x128xf32>
    tpu.vector_store %arg5[%c1_20, %c0_21, %c0_22], %46 {strides = array<i32>} : memref<2x16x128xf32, #tpu.memory_space<vmem>>, vector<1x16x128xf32>,
    return
  }
  func.func @transform_0(%arg0: i32) -> (i32, i32, i32) {
    %c0_i32 = arith.constant 0 : i32
    %c0_i32_0 = arith.constant 0 : i32
    %c0_i32_1 = arith.constant 0 : i32
    return %arg0, %c0_i32, %c0_i32_0 : i32, i32, i32
  }
  func.func @transform_1(%arg0: i32) -> (i32, i32, i32) {
    %c0_i32 = arith.constant 0 : i32
    %c0_i32_0 = arith.constant 0 : i32
    %c0_i32_1 = arith.constant 0 : i32
    return %arg0, %c0_i32, %c0_i32_0 : i32, i32, i32
  }
  func.func @transform_2(%arg0: i32) -> (i32, i32) {
    %c0_i32 = arith.constant 0 : i32
    %c0_i32_0 = arith.constant 0 : i32
    %c0_i32_1 = arith.constant 0 : i32
    return %c0_i32, %c0_i32_0 : i32, i32
  }
  func.func @transform_3(%arg0: i32) -> (i32, i32) {
    %c0_i32 = arith.constant 0 : i32
    %c0_i32_0 = arith.constant 0 : i32
    %c0_i32_1 = arith.constant 0 : i32
    return %c0_i32, %c0_i32_0 : i32, i32
  }
  func.func @transform_4(%arg0: i32) -> (i32, i32, i32) {
    %c0_i32 = arith.constant 0 : i32
    %c0_i32_0 = arith.constant 0 : i32
    %c0_i32_1 = arith.constant 0 : i32
    return %arg0, %c0_i32, %c0_i32_0 : i32, i32, i32
  }
}

</mosaic_0001>

<bundles_post_ra>
// kernel: forward.1
= control target key start
LH: loop header
LB: loop body
LE: loop exit
PB: predicated region body
PF: predicated region fallthrough
CT: control target
= control target key end

     0   :  { %v743_v2 = vmov 0.0   ;;  %vm48_vm0 = vcmask 588800   ;;  %vm257_vm1 = vcmask 130048   ;;  %v242_v40 = vlaneseq  ;;  %s944_s2 = inlined_call_operand.vmem [shape: f32[72,384], index: 2, kind: input, shape index: {}]   ;;  %s945_s1 = inlined_call_operand.vmem [shape: f32[2,16,72], index: 1, kind: input, shape index: {}]   ;;  %s946_s0 = inlined_call_operand.vmem [shape: f32[2,16,16], index: 0, kind: input, shape index: {}]   ;;  %s947_s3 = inlined_call_operand.vmem [shape: f32[1,128], index: 3, kind: input, shape index: {}]   ;;  %s948_s4 = inlined_call_operand.vmem [shape: f32[2,16,128], index: 4, kind: output, shape index: {}]  }
   0x1   :  { %v47_v0 = vld [vmem:[%s944_s2 + $0xd0] sm:$0xff]  ;;  %v44_v1 = vld [vmem:[%s944_s2 + $0xb8] sm:$0xff]  ;;  %125 = vmatprep.mubr.f32.mxu0 %v743_v2  ;;  %v41_v3 = vld [vmem:[%s944_s2 + $0xa0] sm:$0xff]  ;;  %vm351_vm4 = vcmask 261120  }
   0x2   :  { %681 = vmatprep.subr.mxu1 %v47_v0  ;;  %v783_v4 = vld [vmem:[%s945_s1] sm:$0xff]  ;;  %v38_v5 = vld [vmem:[%s944_s2 + $0x88] sm:$0xff]  ;;  %v35_v6 = vld [vmem:[%s944_s2 + $0x70] sm:$0xff]  ;;  %v243_v41 = vshrl.u32 %v242_v40, 7  ;;  %v246_v43 = vand.u32 127, %v242_v40 }
   0x3   :  { %682 = vmatpush3.msra.mxu1 %v47_v0  ;;  %699 = vmatprep.mubr.msk.f32.mxu1 %vm48_vm0, %v783_v4  ;;  %v46_v7 = vld [vmem:[%s944_s2 + $0xc8] sm:$0xff]  ;;  %v45_v8 = vld [vmem:[%s944_s2 + $0xc0] sm:$0xff]  ;;  %v43_v9 = vld [vmem:[%s944_s2 + $0xb0] sm:$0xff] }
   0x4   :  { %683 = vmatprep.subr.mxu1 %v44_v1  ;;  %75 = vmatprep.subr.mxu0 %v46_v7  ;;  %v42_v10 = vld [vmem:[%s944_s2 + $0xa8] sm:$0xff]  ;;  %v40_v11 = vld [vmem:[%s944_s2 + $0x98] sm:$0xff]  ;;  %v39_v13 = vld [vmem:[%s944_s2 + $0x90] sm:$0xff]  ;;  %v244_v42 = vadd.s32 8, %v243_v41  ;;  %vm247_vm3 = vcmp.eq.s32.totalorder %v243_v41, %v246_v43 }
   0x5   :  { %684 = vmatpush3.msra.mxu1 %v44_v1  ;;  %76 = vmatpush1.msra.mxu0 %v45_v8  ;;  %v32_v12 = vld [vmem:[%s944_s2 + $0x58] sm:$0xff]  ;;  %v37_v14 = vld [vmem:[%s944_s2 + $0x80] sm:$0xff]  ;;  %v34_v17 = vld [vmem:[%s944_s2 + $0x68] sm:$0xff]  ;;  %v249_v50 = vsel %vm247_vm3, 1.0, %v743_v2 }
   0x6   :  { %685 = vmatprep.subr.mxu1 %v41_v3  ;;  %77 = vmatprep.subr.mxu0 %v43_v9  ;;  %v29_v15 = vld [vmem:[%s944_s2 + $0x40] sm:$0xff]  ;;  %v36_v16 = vld [vmem:[%s944_s2 + $0x78] sm:$0xff]  ;;  %v26_v18 = vld [vmem:[%s944_s2 + $0x28] sm:$0xff]  ;;  %vm248_vm2 = vcmp.eq.s32.totalorder %v244_v42, %v246_v43 }
   0x7   :  { %686 = vmatpush3.msra.mxu1 %v41_v3  ;;  %78 = vmatpush1.msra.mxu0 %v42_v10  ;;  %v33_v19 = vld [vmem:[%s944_s2 + $0x60] sm:$0xff]  ;;  %v31_v20 = vld [vmem:[%s944_s2 + $0x50] sm:$0xff]  ;;  %v30_v22 = vld [vmem:[%s944_s2 + $0x48] sm:$0xff]  ;;  %v250_v48 = vsel %vm248_vm2, 1.0, %v743_v2 }
   0x8   :  { %687 = vmatprep.subr.mxu1 %v38_v5  ;;  %79 = vmatprep.subr.mxu0 %v40_v11  ;;  %v23_v21 = vld [vmem:[%s944_s2 + $0x10] sm:$0xff]  ;;  %v28_v23 = vld [vmem:[%s944_s2 + $0x38] sm:$0xff]  ;;  %v18_v24 = vld [vmem:[%s945_s1 + $0x8] sm:$0xff] }
   0x9   :  { %688 = vmatpush3.msra.mxu1 %v38_v5  ;;  %80 = vmatpush1.msra.mxu0 %v39_v13  ;;  %v850_v25 = vld [vmem:[%s946_s0 + $0x8] sm:$0xff]  ;;  %v19_v26 = vld [vmem:[%s945_s1 + $0x10] sm:$0xff]  ;;  %v858_v27 = vld [vmem:[%s946_s0] sm:$0xff] }
   0xa   :  { %689 = vmatprep.subr.mxu1 %v35_v6  ;;  %81 = vmatprep.subr.mxu0 %v37_v14  ;;  %v27_v28 = vld [vmem:[%s944_s2 + $0x30] sm:$0xff]  ;;  %v25_v29 = vld [vmem:[%s944_s2 + $0x20] sm:$0xff]  ;;  %v20_v30 = vld [vmem:[%s945_s1 + $0x18] sm:$0xff]  ;;  %v255_v31 = vadd.f32 %v858_v27, %v858_v27  ;;  %v256_v36 = vadd.f32 %v850_v25, %v850_v25 }
   0xb   :  { %690 = vmatpush3.msra.mxu1 %v35_v6  ;;  %82 = vmatpush1.msra.mxu0 %v36_v16  ;;  %v878_v32 = vld [vmem:[%s946_s0 + $0x18] sm:$0xff]  ;;  %v884_v33 = vld [vmem:[%s946_s0 + $0x10] sm:$0xff]  ;;  %v22_v35 = vld [vmem:[%s944_s2 + $0x8] sm:$0xff] }
   0xc   :  { %691 = vmatprep.subr.mxu1 %v32_v12  ;;  %83 = vmatprep.subr.mxu0 %v34_v17  ;;  %v24_v34 = vld [vmem:[%s944_s2 + $0x18] sm:$0xff]  ;;  %v21_v37 = vld [vmem:[%s944_s2] sm:$0xff]  ;;  %v442_v38 = vadd.f32 %v884_v33, %v884_v33  ;;  %v443_v39 = vadd.f32 %v878_v32, %v878_v32  ;;  %s744_s2 = smov 16  }
   0xd   :  { %692 = vmatpush3.msra.mxu1 %v32_v12  ;;  %84 = vmatpush1.msra.mxu0 %v33_v19  ;;  %v635_v10 = vld [vmem:[%s947_s3] ss:$0 sm:$0xff] }
   0xe   :  { %693 = vmatprep.subr.mxu1 %v29_v15  ;;  %85 = vmatprep.subr.mxu0 %v31_v20 }
   0xf   :  { %694 = vmatpush3.msra.mxu1 %v29_v15  ;;  %86 = vmatpush1.msra.mxu0 %v30_v22 }
  0x10   :  { %695 = vmatprep.subr.mxu1 %v26_v18  ;;  %87 = vmatprep.subr.mxu0 %v28_v23 }
  0x11   :  { %696 = vmatpush3.msra.mxu1 %v26_v18  ;;  %88 = vmatpush1.msra.mxu0 %v27_v28 }
  0x12   :  { %697 = vmatprep.subr.mxu1 %v23_v21  ;;  %89 = vmatprep.subr.mxu0 %v25_v29 }
  0x13   :  { %698 = vmatpush3.msra.mxu1 %v23_v21  ;;  %90 = vmatpush1.msra.mxu0 %v24_v34 }
  0x14   :  { %700 = vmatmul.mubr.msk.f32.vlgmr.msra.gmra.mxu1 %vm48_vm0, %v18_v24  ;;  %705 = vmatprep.subr.mxu1 %v850_v25 }
  0x15   :  { %706 = vmatpush3.msra.mxu1 %v850_v25  ;;  %702 = vmatprep.mubr.msk.f32.mxu1 %vm48_vm0, %v19_v26 }
  0x16   :  { %707 = vmatprep.subr.mxu1 %v858_v27  ;;  %91 = vmatprep.subr.mxu0 %v22_v35 }
  0x17   :  { %708 = vmatpush3.msra.mxu1 %v858_v27  ;;  %92 = vmatpush1.msra.mxu0 %v21_v37 }
  0x18   :  { %703 = vmatmul.mubr.msk.f32.gmra.mxu1 %vm48_vm0, %v20_v30  ;;  %723 = vmatprep.subr.mxu1 %v878_v32 }
  0x19   :  { %709 = vmatprep.mubr.msk.f32.mxu1 %vm257_vm1, %v255_v31  ;;  %627 = vmatmul.mubr.msk.f32.vlgmr.msra.gmra.mxu0 %vm48_vm0, %v783_v4 }
  0x1a   :  { %131 = vmatprep.mubr.f32.mxu0 %v743_v2 }
  0x1c   :  { %710 = vmatmul.mubr.msk.f32.vlgmr.msra.gmra.mxu1 %vm257_vm1, %v256_v36 }
  0x1d   :  { %724 = vmatpush3.msra.mxu1 %v878_v32  ;;  %727 = vmatprep.mubr.msk.f32.mxu1 %vm257_vm1, %v442_v38 }
  0x1e   :  { %725 = vmatprep.subr.mxu1 %v884_v33  ;;  %628 = vmatmul.mubr.msk.f32.gmra.mxu0 %vm48_vm0, %v18_v24 }
  0x1f   :  { %726 = vmatpush3.msra.mxu1 %v884_v33  ;;  %137 = vmatprep.mubr.f32.mxu0 %v743_v2 }
  0x20   :  { %728 = vmatmul.mubr.msk.f32.vlgmr.msra.gmra.mxu1 %vm257_vm1, %v443_v39 }
  0x22   :  { %629 = vmatmul.mubr.msk.f32.gmra.mxu0 %vm48_vm0, %v19_v26 }
  0x23   :  { %143 = vmatprep.mubr.f32.mxu0 %v743_v2 }
  0x26   :  { %630 = vmatmul.mubr.msk.f32.gmra.mxu0 %vm48_vm0, %v20_v30 }
  0xd4   :  { %v701_v44 = vpop.f32.mrf.mxu1 }
  0xd5   :  { %712 = vmatprep.subr.mxu0 %v701_v44 }
  0xd6   :  { %v216_v45 = vpop.f32.mrf.mxu1  ;;  %713 = vmatpush3.msra.mxu0 %v701_v44 }
  0xd7   :  { %714 = vmatprep.subr.mxu0 %v216_v45 }
  0xd8   :  { %v704_v46 = vpop.f32.mrf.mxu1  ;;  %715 = vmatpush3.msra.mxu0 %v216_v45 }
  0xd9   :  { %730 = vmatprep.subr.mxu1 %v704_v46  ;;  %v127_v51 = vpop.f32.mrf.mxu0 }
  0xda   :  { %v226_v47 = vpop.f32.mrf.mxu1  ;;  %731 = vmatpush3.msra.mxu1 %v704_v46  ;;  %v253_v13 = vadd.f32 %v635_v10, %v127_v51 }
  0xdb   :  { %732 = vmatprep.subr.mxu1 %v226_v47  ;;  %v129_v54 = vpop.f32.mrf.mxu0 }
  0xdc   :  { %v711_v49 = vpop.f32.mrf.mxu1  ;;  %733 = vmatpush3.msra.mxu1 %v226_v47 }
  0xdd   :  { %v340_v52 = vsub.f32 %v711_v49, %v250_v48 }
  0xde   :  { %v330_v53 = vpop.f32.mrf.mxu1  ;;  %v133_v57 = vpop.f32.mrf.mxu0 }
  0xdf   :  { %v339_v55 = vsub.f32 %v330_v53, %v249_v50  ;;  %345 = vrot.lane.b32.xlu1 %v340_v52, %s744_s2  ;;  %v254_v11 = vadd.f32 %v635_v10, %v133_v57 }
  0xe0   :  { %v729_v56 = vpop.f32.mrf.mxu1  ;;  %v135_v60 = vpop.f32.mrf.mxu0 }
  0xe1   :  { %v526_v58 = vsub.f32 %v729_v56, %v250_v48  ;;  %343 = vrot.lane.b32.xlu0 %v339_v55, %s744_s2  ;;  %716 = vmatprep.subr.mxu0 %v135_v60 }
  0xe2   :  { %v516_v59 = vpop.f32.mrf.mxu1  ;;  %v139_v62 = vpop.f32.mrf.mxu0  ;;  %717 = vmatpush3.msra.mxu0 %v135_v60 }
  0xe3   :  { %v525_v61 = vsub.f32 %v516_v59, %v249_v50  ;;  %531 = vrot.lane.b32.xlu1 %v526_v58, %s744_s2  ;;  %718 = vmatprep.subr.mxu0 %v129_v54  ;;  %v440_v19 = vadd.f32 %v635_v10, %v139_v62 }
  0xe4   :  { %v141_v63 = vpop.f32.mrf.mxu0  ;;  %719 = vmatpush3.msra.mxu0 %v129_v54 }
  0xe5   :  { %529 = vrot.lane.b32.xlu0 %v525_v61, %s744_s2 }
  0xe6   :  { %v145_v0 = vpop.f32.mrf.mxu0 }
  0xe7   :  { %v441_v16 = vadd.f32 %v635_v10, %v145_v0 }
  0xe8   :  { %v147_v1 = vpop.f32.mrf.mxu0 }
  0xe9   :  { %734 = vmatprep.subr.mxu1 %v147_v1 }
  0xea   :  { %735 = vmatpush3.msra.mxu1 %v147_v1 }
  0xeb   :  { %736 = vmatprep.subr.mxu1 %v141_v63 }
  0xec   :  { %737 = vmatpush3.msra.mxu1 %v141_v63 }
 0x151   :  { %v346_v2 = vpop.permute.xlu1 %345 }
 0x152   :  { %v350_v5 = vsel %vm257_vm1, %v850_v25, %v346_v2 }
 0x153   :  { %v344_v3 = vpop.permute.xlu0 %343 }
 0x154   :  { %v349_v4 = vsel %vm257_vm1, %v858_v27, %v344_v3 }
 0x155   :  { %720 = vmatprep.mubr.msk.f32.mxu0 %vm351_vm4, %v349_v4  ;;  %v532_v6 = vpop.permute.xlu1 %531 }
 0x156   :  { %721 = vmatmul.mubr.msk.f32.vlgmr.msra.gmra.mxu0 %vm351_vm4, %v350_v5  ;;  %v536_v9 = vsel %vm257_vm1, %v878_v32, %v532_v6 }
 0x157   :  { %v530_v7 = vpop.permute.xlu0 %529 }
 0x158   :  { %v535_v8 = vsel %vm257_vm1, %v884_v33, %v530_v7 }
 0x159   :  { %738 = vmatprep.mubr.msk.f32.mxu1 %vm351_vm4, %v535_v8 }
 0x15a   :  { %739 = vmatmul.mubr.msk.f32.vlgmr.msra.gmra.mxu1 %vm351_vm4, %v536_v9 }
 0x216   :  { %v722_v12 = vpop.f32.mrf.mxu0 }
 0x217   :  { %v434_v14 = vadd.f32 %v722_v12, %v254_v11 }
 0x218   :  { %v424_v15 = vpop.f32.mrf.mxu0 }
 0x219   :  { %436 = vst [vmem:[%s948_s4 + $0x8] sm:$0xff] %v434_v14  ;;  %v433_v17 = vadd.f32 %v424_v15, %v253_v13 }
 0x21a   :  { %v740_v18 = vpop.f32.mrf.mxu1 }
 0x21b   :  { %435 = vst [vmem:[%s948_s4] sm:$0xff] %v433_v17  ;;  %v619_v20 = vadd.f32 %v740_v18, %v441_v16 }
 0x21c   :  { %v609_v21 = vpop.f32.mrf.mxu1 }
 0x21d   :  { %647 = vst [vmem:[%s948_s4 + $0x18] sm:$0xff] %v619_v20  ;;  %v618_v22 = vadd.f32 %v609_v21, %v440_v19 }
 0x21f   :  { %646 = vst [vmem:[%s948_s4 + $0x10] sm:$0xff] %v618_v22 }

</bundles_post_ra>
